<compile_context>
chip_gen: v7x
topology: tpu7x:2x2x1
jax: 0.10.0
libtpu: 0.0.40
codegen_flags: <defaults>
</compile_context>

<pallas_src>
import math
import functools

import jax
import jax.numpy as jnp
from jax import lax
from jax.experimental import pallas as pl
from jax.experimental.pallas import tpu as pltpu


_VMEM_LIMIT = 64 * 1024 * 1024   # <= physical VMEM on every generation (v7x: 64 MiB)


def _pick_tile(n: int, cap: int):
    """Largest tile <= cap that divides n and is sublane-friendly (multiple of 8),
    or n itself when n <= cap.  Falls back to a non-dividing multiple-of-8 tile
    (caller handles the padded tail)."""
    cap = max(1, min(cap, n))
    for t in range(cap, 0, -1):
        if n % t == 0 and (t % 8 == 0 or t == n):
            return t, True
    t = max(8, (cap // 8) * 8)
    return t, False


# ---------------------------------------------------------------------------
# Kernel 1: lane-dense linear projection  y = x @ W + b   (output width N = D)
# ---------------------------------------------------------------------------
def _linear_kernel(x_ref, w_ref, b_ref, o_ref):
    acc = jnp.dot(x_ref[...], w_ref[...], preferred_element_type=jnp.float32)
    o_ref[...] = (acc + b_ref[...]).astype(o_ref.dtype)   # single bf16 cast after bias add


def _linear(x2d, w_bf16, b_f32, *, tm_cap=512):
    rows, d_in = x2d.shape
    d_out = w_bf16.shape[1]
    tm, _ = _pick_tile(rows, tm_cap)
    n_m = pl.cdiv(rows, tm)
    return pl.pallas_call(
        _linear_kernel,
        out_shape=jax.ShapeDtypeStruct((rows, d_out), jnp.bfloat16),
        grid_spec=pltpu.PrefetchScalarGridSpec(
            num_scalar_prefetch=0,
            grid=(n_m,),
            in_specs=[pl.BlockSpec((tm, d_in), lambda i: (i, 0)),
                      pl.BlockSpec((d_in, d_out), lambda i: (0, 0)),
                      pl.BlockSpec((1, d_out), lambda i: (0, 0))],
            out_specs=pl.BlockSpec((tm, d_out), lambda i: (i, 0))),
        compiler_params=pltpu.CompilerParams(
            dimension_semantics=("parallel",),
            vmem_limit_bytes=_VMEM_LIMIT),
    )(x2d.astype(jnp.bfloat16), w_bf16, b_f32)


# ---------------------------------------------------------------------------
# Kernel 2: flash-style attention core + fused output projection
# ---------------------------------------------------------------------------
def _flash_attn_kernel(q_ref, k_ref, v_ref, wo_ref, bo_ref, out_ref,
                       m_sc, l_sc, acc_sc, *, kv_len: int, tkv: int, mask_kv: bool):
    ki = pl.program_id(2)

    @pl.when(ki == 0)
    def _():
        m_sc[...] = jnp.full_like(m_sc, -jnp.inf)
        l_sc[...] = jnp.zeros_like(l_sc)
        acc_sc[...] = jnp.zeros_like(acc_sc)

    qh = q_ref[0]   # (H, tq,  d_k) bf16  (1/sqrt(d_k) already folded in)
    kh = k_ref[0]   # (H, tkv, d_k) bf16
    vh = v_ref[0]   # (H, tkv, d_k) bf16

    # Scores for all heads of this (q-tile, kv-tile): bounded (H, tq, tkv) working set.
    s = jnp.einsum('hqd,hkd->hqk', qh, kh,
                   preferred_element_type=jnp.float32)              # f32

    if mask_kv:  # only compiled in when Sk is not a multiple of tkv (padded kv tail)
        kv_pos = ki * tkv + lax.broadcasted_iota(jnp.int32, s.shape, 2)
        s = jnp.where(kv_pos < kv_len, s, -1e30)

    # Online softmax (normalization deferred past the PV matmul).
    m_prev = m_sc[...]
    m_new = jnp.maximum(m_prev, jnp.max(s, axis=-1, keepdims=True))
    alpha = jnp.exp(m_prev - m_new)                                  # (H, tq, 1)
    p = jnp.exp(s - m_new)                                           # f32
    l_sc[...] = alpha * l_sc[...] + jnp.sum(p, axis=-1, keepdims=True)
    acc_sc[...] = alpha * acc_sc[...] + jnp.einsum(
        'hqk,hkd->hqd', p.astype(jnp.bfloat16), vh,
        preferred_element_type=jnp.float32)                          # (H, tq, d_k)
    m_sc[...] = m_new

    # TODO(synk): attention-weight dropout is a no-op in eval mode; mask=None path only.

    @pl.when(ki == pl.num_programs(2) - 1)
    def _():
        o = acc_sc[...] / l_sc[...]                                  # exact normalize, tiny tile
        # Output projection: sum over heads of O_h @ Wo_h == concat(heads) @ Wo.
        out = jnp.sum(
            jnp.einsum('hqd,hde->hqe', o.astype(jnp.bfloat16), wo_ref[...],
                       preferred_element_type=jnp.float32),
            axis=0) + bo_ref[...]                                    # (tq, D) lane-dense
        out_ref[0] = out.astype(out_ref.dtype)


# ---------------------------------------------------------------------------
# Wrapper: full MultiHeadAttention forward
# ---------------------------------------------------------------------------
def multi_head_attention(q, k, v, params, *, heads: int, tq_cap: int = 256, tkv_cap: int = 256):
    """q: (B, Sq, D); k, v: (B, Sk, D); params hold (D, D) weights / (1, D) biases."""
    B, Sq, D = q.shape
    _, Sk, _ = k.shape
    assert D % heads == 0
    d_k = D // heads
    inv_sqrt_dk = 1.0 / math.sqrt(d_k)
    bf16 = jnp.bfloat16

    # --- weight prep (done once by XLA outside the kernels) ---
    wq = (params["wq"] * inv_sqrt_dk).astype(bf16)       # 1/sqrt(d_k) folded into Q projection
    bq = (params["bq"] * inv_sqrt_dk).astype(jnp.float32)
    wk = params["wk"].astype(bf16)
    bk = params["bk"].astype(jnp.float32)
    wv = params["wv"].astype(bf16)
    bv = params["bv"].astype(jnp.float32)
    wo_h = params["wo"].reshape(heads, d_k, D).astype(bf16)          # (H, d_k, D)
    bo = params["bo"].astype(jnp.float32)                            # (1, D)

    # --- projections: one lane-dense (rows, D) @ (D, D) matmul each, done once, bf16 out ---
    qp = _linear(q.reshape(B * Sq, D), wq, bq)
    kp = _linear(k.reshape(B * Sk, D), wk, bk)
    vp = _linear(v.reshape(B * Sk, D), wv, bv)

    # Head-major relayout wrapper-side (cheap bf16 XLA transpose; keeps the kernel
    # free of per-head lane slicing / in-kernel transposes).
    qh = qp.reshape(B, Sq, heads, d_k).transpose(0, 2, 1, 3)         # (B, H, Sq, d_k)
    kh = kp.reshape(B, Sk, heads, d_k).transpose(0, 2, 1, 3)         # (B, H, Sk, d_k)
    vh = vp.reshape(B, Sk, heads, d_k).transpose(0, 2, 1, 3)         # (B, H, Sk, d_k)

    # --- tiling ---
    q_cap = tq_cap
    if B == 1 and Sq >= 16:
        q_cap = min(tq_cap, max(8, Sq // 2))   # guarantee >= 2 parallel grid steps (v7x: 2 TCs)
    tq, _ = _pick_tile(Sq, q_cap)
    tkv, _ = _pick_tile(Sk, tkv_cap)
    n_q = pl.cdiv(Sq, tq)
    n_kv = pl.cdiv(Sk, tkv)
    mask_kv = (tkv * n_kv != Sk)

    kernel = functools.partial(_flash_attn_kernel, kv_len=Sk, tkv=tkv, mask_kv=mask_kv)

    return pl.pallas_call(
        kernel,
        out_shape=jax.ShapeDtypeStruct((B, Sq, D), jnp.float32),
        grid_spec=pltpu.PrefetchScalarGridSpec(
            num_scalar_prefetch=0,
            grid=(B, n_q, n_kv),
            in_specs=[
                pl.BlockSpec((1, heads, tq, d_k), lambda b, qi, ki: (b, 0, qi, 0)),
                pl.BlockSpec((1, heads, tkv, d_k), lambda b, qi, ki: (b, 0, ki, 0)),
                pl.BlockSpec((1, heads, tkv, d_k), lambda b, qi, ki: (b, 0, ki, 0)),
                pl.BlockSpec((heads, d_k, D), lambda b, qi, ki: (0, 0, 0)),
                pl.BlockSpec((1, D), lambda b, qi, ki: (0, 0)),
            ],
            out_specs=pl.BlockSpec((1, tq, D), lambda b, qi, ki: (b, qi, 0)),
            scratch_shapes=[pltpu.VMEM((heads, tq, 1), jnp.float32),     # m
                            pltpu.VMEM((heads, tq, 1), jnp.float32),     # l
                            pltpu.VMEM((heads, tq, d_k), jnp.float32)]), # acc
        compiler_params=pltpu.CompilerParams(
            dimension_semantics=("parallel", "parallel", "arbitrary"),
            vmem_limit_bytes=_VMEM_LIMIT),
    )(qh, kh, vh, wo_h, bo)


# ---------------------------------------------------------------------------
# Pure-JAX f32 reference mirroring the PyTorch module (eval dropout, mask=None)
# ---------------------------------------------------------------------------
def _reference_mha(q, k, v, params, *, heads: int):
    B, S, D = q.shape
    d_k = D // heads

    def lin(x, w, b):
        return x @ w + b[0]

    qp = lin(q, params["wq"], params["bq"]).reshape(B, -1, heads, d_k).transpose(0, 2, 1, 3)
    kp = lin(k, params["wk"], params["bk"]).reshape(B, -1, heads, d_k).transpose(0, 2, 1, 3)
    vp = lin(v, params["wv"], params["bv"]).reshape(B, -1, heads, d_k).transpose(0, 2, 1, 3)

    scores = jnp.einsum("bhqd,bhkd->bhqk", qp, kp) / math.sqrt(d_k)
    p = jax.nn.softmax(scores, axis=-1)
    o = jnp.einsum("bhqk,bhkd->bhqd", p, vp)
    concat = o.transpose(0, 2, 1, 3).reshape(B, -1, D)
    return lin(concat, params["wo"], params["bo"])


if __name__ == "__main__":
    B, S, D, H = 2, 8, 32, 4

    key = jax.random.PRNGKey(0)
    keys = jax.random.split(key, 11)

    # Deterministic synthetic parameters (Linear weights as (in, out), biases as (1, out)).
    scale = 1.0 / math.sqrt(D)
    params = {
        "wq": jax.random.uniform(keys[0], (D, D), jnp.float32, -scale, scale),
        "bq": jax.random.uniform(keys[1], (1, D), jnp.float32, -scale, scale),
        "wk": jax.random.uniform(keys[2], (D, D), jnp.float32, -scale, scale),
        "bk": jax.random.uniform(keys[3], (1, D), jnp.float32, -scale, scale),
        "wv": jax.random.uniform(keys[4], (D, D), jnp.float32, -scale, scale),
        "bv": jax.random.uniform(keys[5], (1, D), jnp.float32, -scale, scale),
        "wo": jax.random.uniform(keys[6], (D, D), jnp.float32, -scale, scale),
        "bo": jax.random.uniform(keys[7], (1, D), jnp.float32, -scale, scale),
    }

    q = jax.random.normal(keys[8], (B, S, D), jnp.float32)
    k = jax.random.normal(keys[9], (B, S, D), jnp.float32)
    v = jax.random.normal(keys[10], (B, S, D), jnp.float32)

    out = multi_head_attention(q, k, v, params, heads=H)
    out = jax.block_until_ready(out)

    ref = _reference_mha(q, k, v, params, heads=H)
    assert out.shape == (B, S, D)
    # Tolerance loosened for bf16 MXU inputs / bf16-stored activations (f32 reference).
    assert jnp.allclose(out, ref, atol=5e-2, rtol=1e-2), "Pallas output mismatch vs reference"

    print("KERNEL_OK")
</pallas_src>

<mosaic_0001>
module attributes {stable_mosaic.version = 11 : i64} {
  func.func @_linear_kernel(%arg0: i32, %arg1: memref<16x32xbf16, #tpu.memory_space<vmem>>, %arg2: memref<32x32xbf16, #tpu.memory_space<vmem>>, %arg3: memref<1x32xf32, #tpu.memory_space<vmem>>, %arg4: memref<16x32xbf16, #tpu.memory_space<vmem>>) attributes {dimension_semantics = [#tpu.dimension_semantics<parallel>], iteration_bounds = array<i64: 1>, scalar_prefetch = 0 : i64, scratch_operands = 0 : i64, tpu.core_type = #tpu.core_type<tc>, window_params = [{transform_indices = @transform_0, window_bounds = array<i64: 16, 32>}, {pipeline_mode = #tpu.pipeline_mode<synchronous>, transform_indices = @transform_1, window_bounds = array<i64: 32, 32>}, {pipeline_mode = #tpu.pipeline_mode<synchronous>, transform_indices = @transform_2, window_bounds = array<i64: 1, 32>}, {transform_indices = @transform_3, window_bounds = array<i64: 16, 32>}]} {
    %c0 = arith.constant 0 : index
    %c0_0 = arith.constant 0 : index
    %0 = vector.load %arg1[%c0, %c0_0] : memref<16x32xbf16, #tpu.memory_space<vmem>>, vector<16x32xbf16>
    %c0_1 = arith.constant 0 : index
    %c0_2 = arith.constant 0 : index
    %1 = vector.load %arg2[%c0_1, %c0_2] : memref<32x32xbf16, #tpu.memory_space<vmem>>, vector<32x32xbf16>
    %cst = arith.constant dense<0.000000e+00> : vector<16x32xf32>
    %2 = tpu.matmul %0, %1, %cst {dimension_numbers = #tpu.dot_dimension_numbers<[1], [0], [0], [1], [0, 0, 1, 1], [], []>} : vector<16x32xbf16>, vector<32x32xbf16>, vector<16x32xf32> -> vector<16x32xf32>
    %c0_3 = arith.constant 0 : index
    %c0_4 = arith.constant 0 : index
    %3 = vector.load %arg3[%c0_3, %c0_4] : memref<1x32xf32, #tpu.memory_space<vmem>>, vector<1x32xf32>
    %4 = vector.broadcast %3 : vector<1x32xf32> to vector<16x32xf32>
    %5 = arith.addf %2, %4 : vector<16x32xf32>
    %6 = arith.truncf %5 : vector<16x32xf32> to vector<16x32xbf16>
    %c0_5 = arith.constant 0 : index
    %c0_6 = arith.constant 0 : index
    %7 = vector.load %arg4[%c0_5, %c0_6] : memref<16x32xbf16, #tpu.memory_space<vmem>>, vector<16x32xbf16>
    tpu.vector_store %arg4[%c0_5, %c0_6], %6 {strides = array<i32>} : memref<16x32xbf16, #tpu.memory_space<vmem>>, vector<16x32xbf16>,
    return
  }
  func.func @transform_0(%arg0: i32) -> (i32, i32) {
    %c0_i32 = arith.constant 0 : i32
    %c0_i32_0 = arith.constant 0 : i32
    return %arg0, %c0_i32 : i32, i32
  }
  func.func @transform_1(%arg0: i32) -> (i32, i32) {
    %c0_i32 = arith.constant 0 : i32
    %c0_i32_0 = arith.constant 0 : i32
    %c0_i32_1 = arith.constant 0 : i32
    return %c0_i32, %c0_i32_0 : i32, i32
  }
  func.func @transform_2(%arg0: i32) -> (i32, i32) {
    %c0_i32 = arith.constant 0 : i32
    %c0_i32_0 = arith.constant 0 : i32
    %c0_i32_1 = arith.constant 0 : i32
    return %c0_i32, %c0_i32_0 : i32, i32
  }
  func.func @transform_3(%arg0: i32) -> (i32, i32) {
    %c0_i32 = arith.constant 0 : i32
    %c0_i32_0 = arith.constant 0 : i32
    return %arg0, %c0_i32 : i32, i32
  }
}

</mosaic_0001>

<bundles_post_ra>
// kernel: tpu_custom_call.1
= control target key start
LH: loop header
LB: loop body
LE: loop exit
PB: predicated region body
PF: predicated region fallthrough
CT: control target
= control target key end

     0   :  { %8 = vsyncpa [#allocation3], 0  ;;  %s376_s0 = inlined_call_operand.hbm [shape: bf16[16,32], index: 0, kind: input, shape index: {}]   ;;  %s377_s1 = inlined_call_operand.hbm [shape: bf16[32,32], index: 1, kind: input, shape index: {}]   ;;  %s378_s2 = inlined_call_operand.hbm [shape: f32[1,32], index: 2, kind: input, shape index: {}]   ;;  %s379_s3 = inlined_call_operand.hbm [shape: bf16[16,32], index: 3, kind: output, shape index: {}]  }
   0x1   :  { %9 = vsyncpa [#allocation6], 0 }
   0x2   :  { %10 = vsyncpa [#allocation4], 0  ;;  %s284_s12 = smov [#allocation5]   ;;  %s285_s14 = smov [#allocation2]  }
   0x3   :  { %s28_s13 = sshll.u32 %s284_s12, 4  ;;  %s16_s15 = sshll.u32 %s285_s14, 4  ;;  %s29_s13 = int_to_ptr.vmem [resolvable:$true] %s28_s13  ;;  %s312_s15 = int_to_ptr.vmem [resolvable:$true] %s16_s15 }
   0x4   :  { %s190_s18 = scalar_lea.hbm %s377_s1, 256 }
   0x5   :  { %p191_p0 = scmp.ne.s32.totalorder %s377_s1, %s190_s18  ;;  %p194_p1 = scmp.lt.u32.totalorder %s190_s18, %s377_s1 }
   0x7   :  { %p196_p2 = pnand %p194_p1, %p191_p0 }
   0x9   :  { %199 = shalt.err (!%p196_p2)
}
   0xa   :  { %s200_s23 = scalar_lea.vmem %s29_s13, 256  ;;  %p205_p4 = scmp.lt.s32.totalorder %s29_s13, %s29_s13 }
   0xb   :  { %p201_p3 = scmp.ne.s32.totalorder %s29_s13, %s200_s23  ;;  %p206_p5 = scmp.lt.s32.totalorder %s200_s23, %s200_s23 }
   0xd   :  { %p207_p6 = por %p206_p5, %p205_p4 }
   0xf   :  { %p208_p7 = pnand %p207_p6, %p201_p3 }
  0x11   :  { %211 = shalt.err (!%p208_p7)
}
  0x12   :  { %s286_s24 = smov 64   ;;  %s287_s25 = smov 4  }
  0x13   :  { %34 = dma.hbm_to_vmem [thread:$0]  %s377_s1, 256, %s29_s13, [#allocation6], %s286_s24, %s286_s24, %s287_s25  }
  0x14   :  { %s212_s30 = scalar_lea.hbm %s376_s0, 128 }
  0x15   :  { %p213_p8 = scmp.ne.s32.totalorder %s376_s0, %s212_s30  ;;  %p216_p9 = scmp.lt.u32.totalorder %s212_s30, %s376_s0 }
  0x17   :  { %p218_p10 = pnand %p216_p9, %p213_p8 }
  0x19   :  { %221 = shalt.err (!%p218_p10)
}
  0x1a   :  { %s222_s8 = scalar_lea.vmem %s312_s15, 128  ;;  %p227_p12 = scmp.lt.s32.totalorder %s312_s15, %s312_s15 }
  0x1b   :  { %p223_p11 = scmp.ne.s32.totalorder %s312_s15, %s222_s8  ;;  %p228_p13 = scmp.lt.s32.totalorder %s222_s8, %s222_s8 }
  0x1d   :  { %p229_p0 = por %p228_p13, %p227_p12 }
  0x1f   :  { %p230_p1 = pnand %p229_p0, %p223_p11 }
  0x21   :  { %233 = shalt.err (!%p230_p1)
}
  0x22   :  { %22 = dma.hbm_to_vmem [thread:$0]  %s376_s0, 128, %s312_s15, [#allocation3], %s286_s24, %s286_s24, %s287_s25  }
  0x23   :  { %s288_s10 = smov [#allocation7]   ;;  %s234_s14 = scalar_lea.hbm %s378_s2, 16 }
  0x24   :  { %s41_s11 = sshll.u32 %s288_s10, 4  ;;  %p235_p2 = scmp.ne.s32.totalorder %s378_s2, %s234_s14  ;;  %s42_s11 = int_to_ptr.vmem [resolvable:$true] %s41_s11 }
  0x25   :  { %p238_p3 = scmp.lt.u32.totalorder %s234_s14, %s378_s2 }
  0x27   :  { %p240_p4 = pnand %p238_p3, %p235_p2 }
  0x29   :  { %243 = shalt.err (!%p240_p4)
}
  0x2a   :  { %s244_s20 = scalar_lea.vmem %s42_s11, 16  ;;  %s248_s0 = scalar_lea.vmem %s42_s11, 32 }
  0x2b   :  { %p245_p5 = scmp.ne.s32.totalorder %s42_s11, %s244_s20  ;;  %p249_p6 = scmp.lt.s32.totalorder %s42_s11, %s42_s11 }
  0x2c   :  { %p250_p7 = scmp.lt.s32.totalorder %s248_s0, %s244_s20 }
  0x2e   :  { %p251_p8 = por %p250_p7, %p249_p6 }
  0x30   :  { %p252_p9 = pnand %p251_p8, %p245_p5 }
  0x32   :  { %255 = shalt.err (!%p252_p9)
}
  0x33   :  { %44 = dma.hbm_to_vmem [thread:$0]  %s378_s2, 16, %s42_s11, [#allocation6]  }
  0x34   :  { %278 = dma.done.wait [#allocation3], 128  }
  0x35   :  { %279 = vsyncadd [#allocation3], 4294967168 }
  0x36   :  { %280 = dma.done.wait [#allocation6], 272  }
  0x37   :  { %281 = vsyncadd [#allocation6], 4294967024  ;;  %v289_v0 = vmov 0.0   ;;  %vm290_vm0 = vmmov 0   ;;  %v187_v1 = vld [vmem:[#allocation5] sm:$0xff]   ;;  %v188_v2 = vld [vmem:[#allocation5 + $0x8] sm:$0xff]  }
  0x38   :  { %171 = vmatprep.subr.bf16.mxu0 %v289_v0  ;;  %175 = vmatprep.mubr.msk.bf16.mxu0 %vm290_vm0, %v289_v0  ;;  %v189_v3 = vld [vmem:[#allocation2] sm:$0xff]   ;;  %vm85_vm1 = vcmask 261120   ;;  %v159_v4 = vld [vmem:[#allocation7] ss:$0 sm:$0xff]  ;;  %vm138_vm2 = vcmask 257024   ;;  %s291_s2 = smov [#allocation8]  }
  0x39   :  { %172 = vmatpush3.bf16.msra.mxu0 %v187_v1  ;;  %s146_s22 = sshll.u32 %s291_s2, 4  ;;  %s147_s22 = int_to_ptr.vmem [resolvable:$true] %s146_s22 }
  0x3a   :  { %173 = vmatprep.subr.bf16.mxu0 %v289_v0  ;;  %s256_s23 = scalar_lea.vmem %s147_s22, 128  ;;  %p261_p11 = scmp.lt.s32.totalorder %s147_s22, %s147_s22 }
  0x3b   :  { %p257_p10 = scmp.ne.s32.totalorder %s147_s22, %s256_s23  ;;  %p262_p12 = scmp.lt.s32.totalorder %s256_s23, %s256_s23 }
  0x3d   :  { %174 = vmatpush3.bf16.msra.mxu0 %v188_v2  ;;  %p263_p13 = por %p262_p12, %p261_p11 }
  0x3f   :  { %p264_p0 = pnand %p263_p13, %p257_p10 }
  0x40   :  { %176 = vmatmul.mubr.msk.bf16.vlgmr.msra.gmra.mrb[0].mxu0 %vm85_vm1, %v189_v3 }
 0x113   :  { %v123_v5 = vpop.f32.mrb[0].mxu0 }
 0x114   :  { %v124_v6 = vadd.f32 %v159_v4, %v123_v5  ;;  %v177_v7 = vpop.f32.mrb[1].mxu0 }
 0x115   :  { %v126_v8 = vpop.f32.mrb[2].mxu0 }
 0x116   :  { %v166_v9 = vpack.c.bf16 %v124_v6, %v124_v6  ;;  %v127_v10 = vadd.f32 %v159_v4, %v126_v8  ;;  %v178_v11 = vpop.f32.mrb[3].mxu0 }
 0x118   :  { %v167_v12 = vpack.c.bf16 %v127_v10, %v127_v10  ;;  %139 = vst.msk [vmem:[#allocation8] sm:$0xf] %vm138_vm2, %v166_v9 }
 0x11a   :  { %140 = vst.msk [vmem:[#allocation8 + $0x4] sm:$0xf] %vm138_vm2, %v167_v12 }
 0x11b   :  { %267 = shalt.err (!%p264_p0)
}
 0x11c   :  { %s268_s28 = scalar_lea.hbm %s379_s3, 128 }
 0x11d   :  { %p269_p1 = scmp.ne.s32.totalorder %s379_s3, %s268_s28  ;;  %p272_p2 = scmp.lt.u32.totalorder %s268_s28, %s379_s3 }
 0x11f   :  { %p274_p3 = pnand %p272_p2, %p269_p1 }
 0x121   :  { %277 = shalt.err (!%p274_p3)
}
 0x122   :  { %152 = dma.vmem_to_hbm [thread:$0]  %s147_s22, 128, %s379_s3, [#allocation4], %s286_s24, %s286_s24, %s287_s25  }
 0x123   :  { %282 = dma.done.wait [#allocation4], 128  }
 0x124   :  { %283 = vsyncadd [#allocation4], 4294967168 }
 0x125   :  { %156 = vsyncpa [#allocation3], 1 }
 0x126   :  { %157 = vsyncpa [#allocation6], 1 }
 0x127   :  { %158 = vsyncpa [#allocation4], 1 }

</bundles_post_ra>
